<compile_context>
chip_gen: v5e
topology: v5e:2x2
jax: 0.10.0
libtpu: 0.0.40
codegen_flags: <defaults>
</compile_context>

<pallas_src>
import jax
import jax.numpy as jnp
from jax.experimental import pallas as pl
from jax.experimental.pallas import tpu as pltpu


def _outconv_kernel(x_ref, w_ref, b_ref, o_ref):
    # x_ref: (1, C_in, T)  VMEM      w_ref: (C_out, C_in) SMEM
    # b_ref: (C_out,)      SMEM      o_ref: (1, C_out, T) VMEM
    c_in = x_ref.shape[1]
    c_out = o_ref.shape[1]

    x = x_ref[0]  # (C_in, T), loaded once per tile
    for oc in range(c_out):
        acc = x[0:1, :] * w_ref[oc, 0]                 # (1, T) VPU scalar*vector
        for ic in range(1, c_in):
            acc = acc + x[ic:ic + 1, :] * w_ref[oc, ic]
        o_ref[0, oc:oc + 1, :] = acc + b_ref[oc]       # lane-dense store


def _round_up(a, b):
    return (a + b - 1) // b * b


def outconv_pallas(x_nchw, weight_oihw, bias, *, lane_tile=8192):
    """1x1 conv forward (OutConv).

    x_nchw:      (N, C_in, H, W) float32
    weight_oihw: (C_out, C_in, 1, 1) float32   (PyTorch Conv2d weight layout)
    bias:        (C_out,) float32
    returns:     (N, C_out, H, W) float32
    """
    N, C_in, H, W = x_nchw.shape
    C_out = weight_oihw.shape[0]
    HW = H * W

    # Free, contiguous reshapes -- no transpose, no extra HBM pass.
    x3d = x_nchw.reshape(N, C_in, HW)
    w2d = weight_oihw.reshape(C_out, C_in)

    # Lane tile: large multiple of 128, capped at lane_tile.
    T = min(lane_tile, _round_up(HW, 128))
    grid = (N, pl.cdiv(HW, T))

    out3d = pl.pallas_call(
        _outconv_kernel,
        out_shape=jax.ShapeDtypeStruct((N, C_out, HW), x_nchw.dtype),
        grid=grid,
        in_specs=[
            pl.BlockSpec((1, C_in, T), lambda n, i: (n, 0, i)),   # x tile
            pl.BlockSpec(memory_space=pltpu.MemorySpace.SMEM),    # weights (whole)
            pl.BlockSpec(memory_space=pltpu.MemorySpace.SMEM),    # bias (whole)
        ],
        out_specs=pl.BlockSpec((1, C_out, T), lambda n, i: (n, 0, i)),
        compiler_params=pltpu.CompilerParams(
            dimension_semantics=("parallel", "parallel"),
        ),
    )(x3d, w2d, bias)

    return out3d.reshape(N, C_out, H, W)


def outconv_reference(x_nchw, weight_oihw, bias):
    # Pure-JAX reference of the 1x1 conv (channel contraction).
    w2d = weight_oihw.reshape(weight_oihw.shape[0], weight_oihw.shape[1])
    return jnp.einsum("nchw,oc->nohw", x_nchw, w2d) + bias[None, :, None, None]


if __name__ == "__main__":
    # Module config (small, consistent with OutConv(in_channels, num_classes))
    N, C_in, H, W = 2, 4, 16, 16
    num_classes = 3

    key = jax.random.PRNGKey(0)
    kx, kw, kb = jax.random.split(key, 3)

    x = jax.random.normal(kx, (N, C_in, H, W), dtype=jnp.float32)
    # PyTorch Conv2d weight shape: (O, I, 1, 1)
    weight = jax.random.normal(kw, (num_classes, C_in, 1, 1), dtype=jnp.float32) * 0.1
    bias = jax.random.normal(kb, (num_classes,), dtype=jnp.float32) * 0.1

    y = outconv_pallas(x, weight, bias)
    y = jax.block_until_ready(y)

    y_ref = outconv_reference(x, weight, bias)
    assert y.shape == (N, num_classes, H, W)
    assert jnp.allclose(y, y_ref, atol=1e-5, rtol=1e-5), "mismatch vs reference"

    print("KERNEL_OK")
</pallas_src>

<mosaic_0001>
module attributes {stable_mosaic.version = 11 : i64} {
  func.func @_outconv_kernel(%arg0: i32, %arg1: i32, %arg2: memref<1x4x256xf32, #tpu.memory_space<vmem>>, %arg3: memref<3x4xf32, #tpu.memory_space<smem>>, %arg4: memref<3xf32, #tpu.memory_space<smem>>, %arg5: memref<1x3x256xf32, #tpu.memory_space<vmem>>) attributes {dimension_semantics = [#tpu.dimension_semantics<parallel>, #tpu.dimension_semantics<parallel>], iteration_bounds = array<i64: 2, 1>, scalar_prefetch = 0 : i64, scratch_operands = 0 : i64, tpu.core_type = #tpu.core_type<tc>, window_params = [{transform_indices = @transform_0, window_bounds = array<i64: 1, 4, 256>}, {transform_indices = @transform_1, window_bounds = array<i64: 3, 4>}, {transform_indices = @transform_2, window_bounds = array<i64: 3>}, {transform_indices = @transform_3, window_bounds = array<i64: 1, 3, 256>}]} {
    %c0 = arith.constant 0 : index
    %c0_0 = arith.constant 0 : index
    %c0_1 = arith.constant 0 : index
    %0 = vector.load %arg2[%c0, %c0_0, %c0_1] : memref<1x4x256xf32, #tpu.memory_space<vmem>>, vector<1x4x256xf32>
    %1 = vector.shape_cast %0 : vector<1x4x256xf32> to vector<4x256xf32>
    %2 = vector.extract_strided_slice %1 {offsets = [0, 0], sizes = [1, 256], strides = [1, 1]} : vector<4x256xf32> to vector<1x256xf32>
    %c0_2 = arith.constant 0 : index
    %c0_3 = arith.constant 0 : index
    %3 = memref.load %arg3[%c0_2, %c0_3] : memref<3x4xf32, #tpu.memory_space<smem>>
    %4 = vector.broadcast %3 : f32 to vector<1x256xf32>
    %5 = arith.mulf %2, %4 : vector<1x256xf32>
    %6 = vector.extract_strided_slice %1 {offsets = [1, 0], sizes = [1, 256], strides = [1, 1]} : vector<4x256xf32> to vector<1x256xf32>
    %c0_4 = arith.constant 0 : index
    %c1 = arith.constant 1 : index
    %7 = memref.load %arg3[%c0_4, %c1] : memref<3x4xf32, #tpu.memory_space<smem>>
    %8 = vector.broadcast %7 : f32 to vector<1x256xf32>
    %9 = arith.mulf %6, %8 : vector<1x256xf32>
    %10 = arith.addf %5, %9 : vector<1x256xf32>
    %11 = vector.extract_strided_slice %1 {offsets = [2, 0], sizes = [1, 256], strides = [1, 1]} : vector<4x256xf32> to vector<1x256xf32>
    %c0_5 = arith.constant 0 : index
    %c2 = arith.constant 2 : index
    %12 = memref.load %arg3[%c0_5, %c2] : memref<3x4xf32, #tpu.memory_space<smem>>
    %13 = vector.broadcast %12 : f32 to vector<1x256xf32>
    %14 = arith.mulf %11, %13 : vector<1x256xf32>
    %15 = arith.addf %10, %14 : vector<1x256xf32>
    %16 = vector.extract_strided_slice %1 {offsets = [3, 0], sizes = [1, 256], strides = [1, 1]} : vector<4x256xf32> to vector<1x256xf32>
    %c0_6 = arith.constant 0 : index
    %c3 = arith.constant 3 : index
    %17 = memref.load %arg3[%c0_6, %c3] : memref<3x4xf32, #tpu.memory_space<smem>>
    %18 = vector.broadcast %17 : f32 to vector<1x256xf32>
    %19 = arith.mulf %16, %18 : vector<1x256xf32>
    %20 = arith.addf %15, %19 : vector<1x256xf32>
    %c0_7 = arith.constant 0 : index
    %21 = memref.load %arg4[%c0_7] : memref<3xf32, #tpu.memory_space<smem>>
    %22 = vector.broadcast %21 : f32 to vector<1x256xf32>
    %23 = arith.addf %20, %22 : vector<1x256xf32>
    %c0_8 = arith.constant 0 : index
    %c0_9 = arith.constant 0 : index
    %c0_10 = arith.constant 0 : index
    %24 = vector.load %arg5[%c0_8, %c0_9, %c0_10] : memref<1x3x256xf32, #tpu.memory_space<vmem>>, vector<1x1x256xf32>
    %25 = vector.shape_cast %24 : vector<1x1x256xf32> to vector<1x256xf32>
    %26 = vector.shape_cast %23 : vector<1x256xf32> to vector<1x1x256xf32>
    tpu.vector_store %arg5[%c0_8, %c0_9, %c0_10], %26 {strides = array<i32>} : memref<1x3x256xf32, #tpu.memory_space<vmem>>, vector<1x1x256xf32>,
    %27 = vector.extract_strided_slice %1 {offsets = [0, 0], sizes = [1, 256], strides = [1, 1]} : vector<4x256xf32> to vector<1x256xf32>
    %c1_11 = arith.constant 1 : index
    %c0_12 = arith.constant 0 : index
    %28 = memref.load %arg3[%c1_11, %c0_12] : memref<3x4xf32, #tpu.memory_space<smem>>
    %29 = vector.broadcast %28 : f32 to vector<1x256xf32>
    %30 = arith.mulf %27, %29 : vector<1x256xf32>
    %31 = vector.extract_strided_slice %1 {offsets = [1, 0], sizes = [1, 256], strides = [1, 1]} : vector<4x256xf32> to vector<1x256xf32>
    %c1_13 = arith.constant 1 : index
    %c1_14 = arith.constant 1 : index
    %32 = memref.load %arg3[%c1_13, %c1_14] : memref<3x4xf32, #tpu.memory_space<smem>>
    %33 = vector.broadcast %32 : f32 to vector<1x256xf32>
    %34 = arith.mulf %31, %33 : vector<1x256xf32>
    %35 = arith.addf %30, %34 : vector<1x256xf32>
    %36 = vector.extract_strided_slice %1 {offsets = [2, 0], sizes = [1, 256], strides = [1, 1]} : vector<4x256xf32> to vector<1x256xf32>
    %c1_15 = arith.constant 1 : index
    %c2_16 = arith.constant 2 : index
    %37 = memref.load %arg3[%c1_15, %c2_16] : memref<3x4xf32, #tpu.memory_space<smem>>
    %38 = vector.broadcast %37 : f32 to vector<1x256xf32>
    %39 = arith.mulf %36, %38 : vector<1x256xf32>
    %40 = arith.addf %35, %39 : vector<1x256xf32>
    %41 = vector.extract_strided_slice %1 {offsets = [3, 0], sizes = [1, 256], strides = [1, 1]} : vector<4x256xf32> to vector<1x256xf32>
    %c1_17 = arith.constant 1 : index
    %c3_18 = arith.constant 3 : index
    %42 = memref.load %arg3[%c1_17, %c3_18] : memref<3x4xf32, #tpu.memory_space<smem>>
    %43 = vector.broadcast %42 : f32 to vector<1x256xf32>
    %44 = arith.mulf %41, %43 : vector<1x256xf32>
    %45 = arith.addf %40, %44 : vector<1x256xf32>
    %c1_19 = arith.constant 1 : index
    %46 = memref.load %arg4[%c1_19] : memref<3xf32, #tpu.memory_space<smem>>
    %47 = vector.broadcast %46 : f32 to vector<1x256xf32>
    %48 = arith.addf %45, %47 : vector<1x256xf32>
    %c0_20 = arith.constant 0 : index
    %c1_21 = arith.constant 1 : index
    %c0_22 = arith.constant 0 : index
    %49 = vector.load %arg5[%c0_20, %c1_21, %c0_22] : memref<1x3x256xf32, #tpu.memory_space<vmem>>, vector<1x1x256xf32>
    %50 = vector.shape_cast %49 : vector<1x1x256xf32> to vector<1x256xf32>
    %51 = vector.shape_cast %48 : vector<1x256xf32> to vector<1x1x256xf32>
    tpu.vector_store %arg5[%c0_20, %c1_21, %c0_22], %51 {strides = array<i32>} : memref<1x3x256xf32, #tpu.memory_space<vmem>>, vector<1x1x256xf32>,
    %52 = vector.extract_strided_slice %1 {offsets = [0, 0], sizes = [1, 256], strides = [1, 1]} : vector<4x256xf32> to vector<1x256xf32>
    %c2_23 = arith.constant 2 : index
    %c0_24 = arith.constant 0 : index
    %53 = memref.load %arg3[%c2_23, %c0_24] : memref<3x4xf32, #tpu.memory_space<smem>>
    %54 = vector.broadcast %53 : f32 to vector<1x256xf32>
    %55 = arith.mulf %52, %54 : vector<1x256xf32>
    %56 = vector.extract_strided_slice %1 {offsets = [1, 0], sizes = [1, 256], strides = [1, 1]} : vector<4x256xf32> to vector<1x256xf32>
    %c2_25 = arith.constant 2 : index
    %c1_26 = arith.constant 1 : index
    %57 = memref.load %arg3[%c2_25, %c1_26] : memref<3x4xf32, #tpu.memory_space<smem>>
    %58 = vector.broadcast %57 : f32 to vector<1x256xf32>
    %59 = arith.mulf %56, %58 : vector<1x256xf32>
    %60 = arith.addf %55, %59 : vector<1x256xf32>
    %61 = vector.extract_strided_slice %1 {offsets = [2, 0], sizes = [1, 256], strides = [1, 1]} : vector<4x256xf32> to vector<1x256xf32>
    %c2_27 = arith.constant 2 : index
    %c2_28 = arith.constant 2 : index
    %62 = memref.load %arg3[%c2_27, %c2_28] : memref<3x4xf32, #tpu.memory_space<smem>>
    %63 = vector.broadcast %62 : f32 to vector<1x256xf32>
    %64 = arith.mulf %61, %63 : vector<1x256xf32>
    %65 = arith.addf %60, %64 : vector<1x256xf32>
    %66 = vector.extract_strided_slice %1 {offsets = [3, 0], sizes = [1, 256], strides = [1, 1]} : vector<4x256xf32> to vector<1x256xf32>
    %c2_29 = arith.constant 2 : index
    %c3_30 = arith.constant 3 : index
    %67 = memref.load %arg3[%c2_29, %c3_30] : memref<3x4xf32, #tpu.memory_space<smem>>
    %68 = vector.broadcast %67 : f32 to vector<1x256xf32>
    %69 = arith.mulf %66, %68 : vector<1x256xf32>
    %70 = arith.addf %65, %69 : vector<1x256xf32>
    %c2_31 = arith.constant 2 : index
    %71 = memref.load %arg4[%c2_31] : memref<3xf32, #tpu.memory_space<smem>>
    %72 = vector.broadcast %71 : f32 to vector<1x256xf32>
    %73 = arith.addf %70, %72 : vector<1x256xf32>
    %c0_32 = arith.constant 0 : index
    %c2_33 = arith.constant 2 : index
    %c0_34 = arith.constant 0 : index
    %74 = vector.load %arg5[%c0_32, %c2_33, %c0_34] : memref<1x3x256xf32, #tpu.memory_space<vmem>>, vector<1x1x256xf32>
    %75 = vector.shape_cast %74 : vector<1x1x256xf32> to vector<1x256xf32>
    %76 = vector.shape_cast %73 : vector<1x256xf32> to vector<1x1x256xf32>
    tpu.vector_store %arg5[%c0_32, %c2_33, %c0_34], %76 {strides = array<i32>} : memref<1x3x256xf32, #tpu.memory_space<vmem>>, vector<1x1x256xf32>,
    return
  }
  func.func @transform_0(%arg0: i32, %arg1: i32) -> (i32, i32, i32) {
    %c0_i32 = arith.constant 0 : i32
    %c0_i32_0 = arith.constant 0 : i32
    return %arg0, %c0_i32, %arg1 : i32, i32, i32
  }
  func.func @transform_1(%arg0: i32, %arg1: i32) -> (i32, i32) {
    %c0_i32 = arith.constant 0 : i32
    %c0_i32_0 = arith.constant 0 : i32
    %c0_i32_1 = arith.constant 0 : i32
    return %c0_i32, %c0_i32_0 : i32, i32
  }
  func.func @transform_2(%arg0: i32, %arg1: i32) -> i32 {
    %c0_i32 = arith.constant 0 : i32
    %c0_i32_0 = arith.constant 0 : i32
    return %c0_i32 : i32
  }
  func.func @transform_3(%arg0: i32, %arg1: i32) -> (i32, i32, i32) {
    %c0_i32 = arith.constant 0 : i32
    %c0_i32_0 = arith.constant 0 : i32
    return %arg0, %c0_i32, %arg1 : i32, i32, i32
  }
}

</mosaic_0001>

<bundles_post_ra>
// kernel: tpu_custom_call.1
= control target key start
LH: loop header
LB: loop body
LE: loop exit
PB: predicated region body
PF: predicated region fallthrough
CT: control target
= control target key end

     0   :  { %8 = vsyncpa [#allocation3], 0  ;;  %s887_s0 = inlined_call_operand.hbm [shape: f32[2,4,256], index: 0, kind: input, shape index: {}]   ;;  %s888_s1 = inlined_call_operand.hbm [shape: f32[3,4], index: 1, kind: input, shape index: {}]   ;;  %s889_s2 = inlined_call_operand.vmem [shape: f32[3], index: 2, kind: input, shape index: {}]   ;;  %s890_s3 = inlined_call_operand.vmem [shape: f32[2,3,256], index: 3, kind: output, shape index: {}]  }
   0x1   :  { %10 = vsyncpa [#allocation3 + $0x1], 0 }
   0x2   :  { %11 = vsyncpa [#allocation4], 0 }
   0x3   :  { %12 = vsyncpa [#allocation5], 0  ;;  %s739_s12 = smov 0   ;;  %s741_s13 = smov 0  }
   0x4   :  { %s743_s14 = smov 0   ;;  %s745_s15 = smov 0  }
   0x5   :  { %s747_s16 = smov 0   ;;  %s749_s17 = smov 0  }
   0x6 LB: > { %s478_s18 = sadd.s32 4294967295, %s715_s17   ;;  %p52_p0 = scmp.ne.s32.totalorder %s699_s13, %s695_s12  ;;  %s715_s17 = sphi %s749_s17, %s18_s17   ;;  %s711_s16 = sphi %s747_s16, %s901_s16   ;;  %s707_s15 = sphi %s745_s15, %s900_s15   ;;  %s703_s14 = sphi %s743_s14, %s899_s14   ;;  %s699_s13 = sphi %s741_s13, %s898_s13   ;;  %s695_s12 = sphi %s739_s12, %s897_s12  }
   0x7   : > { %p769_p1 = scmp.eq.s32.totalorder %s478_s18, 0  ;;  %p480_p2 = scmp.ge.s32.totalorder %s715_s17, 1 }
   0x8   : > { %p133_p3 = scmp.lt.s32.totalorder %s715_s17, 3  ;;  %s145_s23 = sshll.u32 %s888_s1, 4  ;;  %s146_s23 = int_to_ptr.hbm [resolvable:$true] %s145_s23 }
   0x9   : > { %p777_p4 = por %p769_p1, %p52_p0  ;;  %s155_s27 = sshll.u32 %s889_s2, 4  ;;  %s156_s27 = int_to_ptr.vmem [resolvable:$true] %s155_s27 }
   0xa   : > { %p784_p5 = pnand %p480_p2, %p133_p3  ;;  %s717_s28 = smov [#allocation6]  }
   0xb   : > { %s718_s29 = smov [#allocation7]   ;;  %s30_s30 = sadd.s32 1, %s711_s16 }
   0xc   : > { %p531_p6 = pneg %p784_p5  ;;  %s39_s4 = sadd.s32 1, %s703_s14 }
   0xd   : > { %p32_p8 = scmp.ge.s32.totalorder %s30_s30, 2  ;;  %p46_p9 = scmp.ne.s32.totalorder %s703_s14, %s699_s13 }
   0xe   : > { %p532_p7 = pnand %p531_p6, %p769_p1  ;;  %p47_p10 = scmp.eq.s32.totalorder %s715_s17, 0 }
   0xf   : > { %p544_p11 = scmp.lt.s32.totalorder %s715_s17, 2  ;;  %s903_s30 = smov (%p32_p8, %s30_s30), 0 }
  0x10   : > { %534 = dma.hbm_to_smem (!%p532_p7), %s146_s23, 64, %s717_s28, [#allocation4]  }
  0x11   : > { %537 = dma.vmem_to_smem (!%p532_p7), %s156_s27, 16, %s718_s29, [#allocation5]  }
  0x12   : > { %p803_p12 = por %p47_p10, %p46_p9  ;;  %s166_s6 = sand.u32 1, %s703_s14  }
  0x13   : > { %s34_s7 = ssub.s32 %s711_s16, %s903_s30  ;;  %s484_s8 = sshll.u32 %s166_s6, 3 }
  0x14   : > { %p37_p13 = scmp.eq.s32.totalorder %s34_s7, 0  ;;  %s519_s9 = sshll.u32 %s711_s16, 3 }
  0x15   : > { %s177_s18 = scalar_lea.hbm %s887_s0, %s519_s9  ;;  %s170_s21 = scalar_lea.vmem [#allocation2], %s484_s8 }
  0x16   : > { %s812_s10 = scalar_select %p37_p13, %s703_s14, %s39_s4  }
  0x17   : > { %s181_s22 = sshll.u32 %s170_s21, 4  ;;  %s179_s23 = sshll.u32 %s177_s18, 4  ;;  %s182_s22 = int_to_ptr.vmem [resolvable:$true] %s181_s22  ;;  %s180_s23 = int_to_ptr.hbm [resolvable:$true] %s179_s23 }
  0x18   : > { %p539_p0 = pnand %p544_p11, %p803_p12  ;;  %s167_s25 = scalar_lea.sflag [#allocation3], %s166_s6 }
  0x19   : > { %190 = sbr.rel (%p784_p5) target bundleno = 71 (0x47), region = 32  ;;  %s192_s26 = sand.u32 (!%p784_p5), 1, %s699_s13  }
  0x1a   : > { %541 = dma.hbm_to_vmem [thread:$0]  (!%p539_p0), %s180_s23, 128, %s182_s22, %s167_s25  }
  0x1b   : > { %s488_s27 = sshll.u32 (!%p784_p5), %s192_s26, 3  ;;  %s193_s28 = scalar_lea.sflag (!%p784_p5), [#allocation3], %s192_s26 }
  0x1c   : > { %s196_s29 = scalar_lea.vmem (!%p784_p5), [#allocation2], %s488_s27 }
  0x1e   : > { %682 = dma.done.wait (%p777_p4), %s193_s28, 128  }
  0x1f   : > { %684 = vsyncadd (%p777_p4), %s193_s28, 4294967168 }
  0x20   : > { %686 = dma.done.wait (%p769_p1), [#allocation4], 64  }
  0x21   : > { %688 = vsyncadd (%p769_p1), [#allocation4], 4294967232 }
  0x22   : > { %690 = dma.done.wait (%p769_p1), [#allocation5], 16  }
  0x23   : > { %692 = vsyncadd (%p769_p1), [#allocation5], 4294967280 }
  0x24   : > { %212 = sfence }
  0x25   : > { %p237_p2 = scmp.lt.s32.totalorder %s707_s15, 1  ;;  %s247_s24 = sld [smem:[#allocation6]]  ;;  %v246_v0 = vld [vmem:[%s196_s29] sm:$0xff]  ;;  %v282_v20 = vlaneseq  ;;  %vm279_vm0 = vcmask 1040384  }
  0x26   : > { %s493_s4 = sld [smem:[#allocation6 + $0x1]] }
  0x27   : > { %s905_s15 = smov (!%p237_p2, %s707_s15), 1  ;;  %s495_s20 = sld [smem:[#allocation6 + $0x2]]  ;;  %vm850_vm1 = vcmp.lt.s32.totalorder %v282_v20, 256 }
  0x28   : > { %s497_s5 = sld [smem:[#allocation6 + $0x3]]  ;;  %s520_s23 = sshll.u32 %s905_s15, 3 }
  0x29   : > { %s840_s6 = sld [smem:[#allocation7]]  ;;  %s244_s15 = scalar_lea.vmem %s890_s3, %s520_s23 }
  0x2a   : > { %s499_s7 = sld [smem:[#allocation6 + $0x80]] }
  0x2b   : > { %v248_v1 = vstv %s247_s24  ;;  %s500_s8 = sld [smem:[#allocation6 + $0x81]] }
  0x2c   : > { %v251_v2 = vstv %s493_s4  ;;  %v249_v3 = vmul.f32 %v248_v1, %v246_v0  ;;  %s502_s19 = sld [smem:[#allocation6 + $0x82]] }
  0x2d   : > { %v252_v4 = vmul.f32 %v251_v2, %v246_v0  ;;  %v259_v5 = vstv %s495_s20  ;;  %s504_s9 = sld [smem:[#allocation6 + $0x83]] }
  0x2e   : > { %v260_v7 = vmul.f32 %v259_v5, %v246_v0  ;;  %v267_v8 = vstv %s497_s5  ;;  %s842_s11 = sld [smem:[#allocation7 + $0x1]] }
  0x2f   : > { %v494_v6 = vrot.slane %v252_v4, 9  ;;  %v268_v9 = vmul.f32 %v267_v8, %v246_v0  ;;  %s508_s12 = sld [smem:[#allocation6 + $0x100]]  ;;  %v275_v19 = vstv %s840_s6 }
  0x30   : > { %v496_v11 = vrot.slane %v260_v7, 10  ;;  %v288_v12 = vstv %s499_s7  ;;  %s844_s18 = sld [smem:[#allocation6 + $0x101]] }
  0x31   : > { %v257_v10 = vadd.f32 %v494_v6, %v249_v3  ;;  %v498_v13 = vrot.slane %v268_v9, 11  ;;  %v291_v14 = vstv %s500_s8  ;;  %s511_s21 = sld [smem:[#allocation6 + $0x102]]  ;;  %v289_v16 = vmul.f32 %v288_v12, %v246_v0 }
  0x32   : > { %v292_v17 = vmul.f32 %v291_v14, %v246_v0  ;;  %v299_v18 = vstv %s502_s19  ;;  %s846_s22 = sld [smem:[#allocation6 + $0x103]] }
  0x33   : > { %v265_v15 = vadd.f32 %v496_v11, %v257_v10  ;;  %v300_v21 = vmul.f32 %v299_v18, %v246_v0  ;;  %v307_v22 = vstv %s504_s9  ;;  %s515_s25 = sld [smem:[#allocation7 + $0x2]] }
  0x34   : > { %v501_v24 = vrot.slane %v292_v17, 9  ;;  %v308_v25 = vmul.f32 %v307_v22, %v246_v0  ;;  %v315_v39 = vstv %s842_s11 }
  0x35   : > { %v273_v23 = vadd.f32 %v498_v13, %v265_v15  ;;  %v503_v26 = vrot.slane %v300_v21, 10  ;;  %v324_v27 = vstv %s508_s12 }
  0x36   : > { %v297_v29 = vadd.f32 %v501_v24, %v289_v16  ;;  %v505_v30 = vrot.slane %v308_v25, 11  ;;  %v325_v32 = vmul.f32 %v324_v27, %v246_v0  ;;  %v327_v33 = vstv %s844_s18 }
  0x37   : > { %v276_v28 = vadd.f32 %v275_v19, %v273_v23  ;;  %v335_v34 = vstv %s511_s21  ;;  %v328_v37 = vmul.f32 %v327_v33, %v246_v0 }
  0x38   : > { %v305_v36 = vadd.f32 %v503_v26, %v297_v29  ;;  %v336_v38 = vmul.f32 %v335_v34, %v246_v0  ;;  %v343_v40 = vstv %s846_s22 }
  0x39   : > { %v278_v35 = vrot.slane %v276_v28, 3  ;;  %v510_v43 = vrot.slane %v328_v37, 9  ;;  %v344_v45 = vmul.f32 %v343_v40, %v246_v0  ;;  %v351_v51 = vstv %s515_s25 }
  0x3a   : > { %v313_v42 = vadd.f32 %v505_v30, %v305_v36  ;;  %v512_v44 = vrot.slane %v336_v38, 10 }
  0x3b   : > { %v280_v41 = vsel %vm279_vm0, %v276_v28, %v278_v35  ;;  %v333_v47 = vadd.f32 %v510_v43, %v325_v32  ;;  %v514_v48 = vrot.slane %v344_v45, 11 }
  0x3c   : > { %286 = vst.msk [vmem:[%s244_s15] ss:$4 sm:$0x3] %vm850_vm1, %v280_v41  ;;  %v316_v46 = vadd.f32 %v315_v39, %v313_v42 }
  0x3d   : > { %v341_v50 = vadd.f32 %v512_v44, %v333_v47 }
  0x3e   : > { %v318_v49 = vrot.slane %v316_v46, 3 }
  0x3f   : > { %v349_v53 = vadd.f32 %v514_v48, %v341_v50 }
  0x40   : > { %v319_v52 = vsel %vm279_vm0, %v316_v46, %v318_v49 }
  0x41   : > { %507 = vst.msk [vmem:[%s244_s15 + $0x1] ss:$4 sm:$0x3] %vm850_vm1, %v319_v52  ;;  %v352_v54 = vadd.f32 %v351_v51, %v349_v53 }
  0x43   : > { %v354_v55 = vrot.slane %v352_v54, 3 }
  0x45   : > { %v355_v56 = vsel %vm279_vm0, %v352_v54, %v354_v55 }
  0x46   : > { %516 = vst.msk [vmem:[%s244_s15 + $0x2] ss:$4 sm:$0x3] %vm850_vm1, %v355_v56 }
  0x47 PF: > { %s18_s17 = sadd.s32 1, %s715_s17   ;;  %s897_s12 = smov %s699_s13 }
  0x48   : > { %p15_p1 = scmp.ge.s32.totalorder %s18_s17, 4   ;;  %s898_s13 = smov %s703_s14 }
  0x49   : > { %s899_s14 = smov %s812_s10  ;;  %s900_s15 = smov %s711_s16 }
  0x4a   : > { %s901_s16 = smov %s903_s30  ;;  %17 = sbr.rel (!%p15_p1) target bundleno = 6 (0x6), region = 84 }
  0x4f   :  { %389 = vsyncpa [#allocation3], 1 }
  0x50   :  { %391 = vsyncpa [#allocation3 + $0x1], 1 }
  0x51   :  { %392 = vsyncpa [#allocation4], 1 }
  0x52   :  { %394 = vsyncpa [#allocation4 + $0x1], 1 }
  0x53   :  { %395 = vsyncpa [#allocation5], 1 }
  0x54   :  { %397 = vsyncpa [#allocation5 + $0x1], 1 }

</bundles_post_ra>
